<compile_context>
chip_gen: v7x
topology: tpu7x:2x2x1
jax: 0.10.0
libtpu: 0.0.40
codegen_flags: <defaults>
</compile_context>

<pallas_src>
import math
import functools

import jax
import jax.numpy as jnp
from jax.experimental import pallas as pl
from jax.experimental.pallas import tpu as pltpu


# ---------------------------------------------------------------------------
# Pallas kernel: one (batch, head) step per grid point.
# ---------------------------------------------------------------------------
def attention_block_kernel(x_ref, gamma_ref, beta_ref, wqkv_ref, bqkv_ref,
                           wproj_ref, bproj_ref, o_ref, xn_ref, acc_ref, *,
                           num_heads, num_groups, eps, t_actual, tq):
    cdt = wqkv_ref.dtype                      # matmul operand dtype (param_dtype)
    C, Tp = xn_ref.shape
    G = num_groups
    Cg = C // G
    H = num_heads
    ch = C // H
    h = pl.program_id(1)

    # ---- first head step: GroupNorm into xn scratch, zero the accumulator --
    @pl.when(h == 0)
    def _():
        x = x_ref[0].astype(jnp.float32)                          # [C, Tp]
        inv_n = 1.0 / float(Cg * t_actual)                        # padded cols are 0
        row_s = jnp.sum(x, axis=1, keepdims=True)                 # [C, 1]
        row_ss = jnp.sum(x * x, axis=1, keepdims=True)            # [C, 1]
        g_s = jnp.sum(row_s.reshape(G, Cg), axis=1, keepdims=True)
        g_ss = jnp.sum(row_ss.reshape(G, Cg), axis=1, keepdims=True)
        mean = g_s * inv_n
        var = jnp.maximum(g_ss * inv_n - mean * mean, 0.0)        # clamp (review)
        rstd = jax.lax.rsqrt(var + eps)
        mean_c = jnp.broadcast_to(mean, (G, Cg)).reshape(C, 1)
        scale_c = jnp.broadcast_to(rstd, (G, Cg)).reshape(C, 1) * gamma_ref[...]
        xn = (x - mean_c) * scale_c + beta_ref[...]               # [C, Tp] f32
        xn_ref[...] = xn.astype(cdt)
        acc_ref[...] = jnp.zeros_like(acc_ref)

    # ---- per-head qkv slab: [3ch, C] @ [C, Tp] (1/sqrt(ch) folded into q) ---
    w_h = wqkv_ref[0]                                             # [3ch, C]
    b_h = bqkv_ref[0]                                             # [3ch, 1] f32
    qkv_h = jnp.dot(w_h, xn_ref[...],
                    preferred_element_type=jnp.float32) + b_h     # [3ch, Tp] f32
    q = qkv_h[0:ch].astype(cdt)                                   # [ch, Tp]
    k = qkv_h[ch:2 * ch].astype(cdt)                              # [ch, Tp]
    v = qkv_h[2 * ch:3 * ch].astype(cdt)                          # [ch, Tp]
    wp_h = wproj_ref[0]                                           # [C, ch]

    # key-padding mask (static no-op when T is already lane aligned)
    if t_actual != Tp:
        valid = jax.lax.broadcasted_iota(jnp.int32, (1, Tp), 1) < t_actual
    else:
        valid = None

    # ---- q-tiled attention + immediate projection accumulation -------------
    # Only [tq, Tp] logits/probability strips are ever live (review: VMEM).
    nq = Tp // tq
    for qi in range(nq):                       # static unroll (nq is static)
        qs = qi * tq
        # logits[t, s] = sum_c q[c, t] * k[c, s]
        logits = jax.lax.dot_general(q[:, qs:qs + tq], k,
                                     (((0,), (0,)), ((), ())),
                                     preferred_element_type=jnp.float32)
        if valid is not None:
            logits = jnp.where(valid, logits, -1e30)
        m = jnp.max(logits, axis=-1, keepdims=True)
        p = jnp.exp(logits - m)
        p = p * pl.reciprocal(jnp.sum(p, axis=-1, keepdims=True), approx=True)
        # a^T[t, c] = sum_s p[t, s] * v[c, s]   (no [Tp,Tp] transpose; review)
        a_t = jax.lax.dot_general(p.astype(cdt), v,
                                  (((1,), (1,)), ((), ())),
                                  preferred_element_type=jnp.float32)   # [tq, ch]
        # this head's proj_out contribution, already in [C, tq] layout
        acc_ref[:, qs:qs + tq] += jax.lax.dot_general(
            wp_h, a_t.astype(cdt), (((1,), (1,)), ((), ())),
            preferred_element_type=jnp.float32)

    # ---- last head step: proj bias + residual, written in the input dtype --
    @pl.when(h == H - 1)
    def _():
        x = x_ref[0].astype(jnp.float32)
        o_ref[0] = (x + acc_ref[...] + bproj_ref[...]).astype(o_ref.dtype)


# ---------------------------------------------------------------------------
# Wrapper
# ---------------------------------------------------------------------------
def attention_block_forward(x, params, *, num_heads, num_groups, eps=1e-5,
                            param_dtype=jnp.bfloat16, q_tile=256):
    B, C, Hsp, Wsp = x.shape
    assert C % num_groups == 0 and C % num_heads == 0
    T = Hsp * Wsp
    Tp = ((T + 127) // 128) * 128            # lane-dense padded sequence length
    H = num_heads
    ch = C // H

    # Keep x in its native dtype (cast to f32 happens in-kernel); pad only if
    # needed.  Callers already holding [B, C, T] activations can skip this.
    x3 = x.reshape(B, C, T)
    if Tp != T:
        x3 = jnp.pad(x3, ((0, 0), (0, 0), (0, Tp - T)))

    # Per-head weight layout + scale folding (host-side, tiny).
    qscale = 1.0 / math.sqrt(ch)             # (ch**-0.25)**2 folded into q only
    w_qkv = params["w_qkv"].astype(jnp.float32)
    b_qkv = params["b_qkv"].astype(jnp.float32)
    wq = (w_qkv[0:C] * qscale).reshape(H, ch, C)
    wk = w_qkv[C:2 * C].reshape(H, ch, C)
    wv = w_qkv[2 * C:3 * C].reshape(H, ch, C)
    w_qkv_h = jnp.concatenate([wq, wk, wv], axis=1).astype(param_dtype)   # [H,3ch,C]
    bq = (b_qkv[0:C] * qscale).reshape(H, ch)
    bk = b_qkv[C:2 * C].reshape(H, ch)
    bv = b_qkv[2 * C:3 * C].reshape(H, ch)
    b_qkv_h = jnp.concatenate([bq, bk, bv], axis=1).reshape(H, 3 * ch, 1)  # f32
    w_proj_h = (params["w_proj"].astype(param_dtype)
                .reshape(C, H, ch).transpose(1, 0, 2))                     # [H,C,ch]
    b_proj = params["b_proj"].reshape(C, 1).astype(jnp.float32)
    gamma = params["gamma"].reshape(C, 1).astype(jnp.float32)
    beta = params["beta"].reshape(C, 1).astype(jnp.float32)

    # q-tile size: 128/256 rows, must divide Tp (Tp is a multiple of 128).
    tq = q_tile if (q_tile <= Tp and Tp % q_tile == 0) else 128

    # Explicit scoped-VMEM budget derived from the real buffers (review).
    xbytes = jnp.dtype(x.dtype).itemsize
    pbytes = jnp.dtype(param_dtype).itemsize
    est = (2 * C * Tp * xbytes                    # x block, double-buffered
           + 2 * C * Tp * xbytes                  # out block
           + C * Tp * pbytes                      # xn scratch
           + C * Tp * 4                           # f32 proj accumulator
           + 2 * (3 * ch * C + C * max(ch, 128)) * pbytes   # weight blocks
           + 4 * tq * Tp * 4                      # logits / p temporaries
           + 3 * ch * Tp * 4)                     # per-head qkv slab
    vmem_limit = int(min(max(est * 3 // 2, 32 * 2 ** 20), 100 * 2 ** 20))

    kernel = functools.partial(attention_block_kernel,
                               num_heads=H, num_groups=num_groups,
                               eps=eps, t_actual=T, tq=tq)

    out = pl.pallas_call(
        kernel,
        out_shape=jax.ShapeDtypeStruct((B, C, Tp), x.dtype),
        grid_spec=pltpu.PrefetchScalarGridSpec(
            num_scalar_prefetch=0,
            grid=(B, H),
            in_specs=[
                pl.BlockSpec((1, C, Tp), lambda b, h: (b, 0, 0)),      # x
                pl.BlockSpec((C, 1), lambda b, h: (0, 0)),             # gamma
                pl.BlockSpec((C, 1), lambda b, h: (0, 0)),             # beta
                pl.BlockSpec((1, 3 * ch, C), lambda b, h: (h, 0, 0)),  # w_qkv[h]
                pl.BlockSpec((1, 3 * ch, 1), lambda b, h: (h, 0, 0)),  # b_qkv[h]
                pl.BlockSpec((1, C, ch), lambda b, h: (h, 0, 0)),      # w_proj[:,h]
                pl.BlockSpec((C, 1), lambda b, h: (0, 0)),             # b_proj
            ],
            out_specs=pl.BlockSpec((1, C, Tp), lambda b, h: (b, 0, 0)),
            scratch_shapes=[
                pltpu.VMEM((C, Tp), param_dtype),   # xn (matmul-dtype scratch)
                pltpu.VMEM((C, Tp), jnp.float32),   # proj_out accumulator
            ],
        ),
        compiler_params=pltpu.CompilerParams(
            dimension_semantics=("parallel", "arbitrary"),
            vmem_limit_bytes=vmem_limit),
    )(x3, gamma, beta, w_qkv_h, b_qkv_h, w_proj_h, b_proj)

    if Tp != T:
        out = out[:, :, :T]
    return out.reshape(B, C, Hsp, Wsp)


# ---------------------------------------------------------------------------
# Pure-JAX reference (mirrors the PyTorch forward semantics)
# ---------------------------------------------------------------------------
def reference_forward(x, params, *, num_heads, num_groups, eps=1e-5):
    B, C, Hsp, Wsp = x.shape
    T = Hsp * Wsp
    x3 = x.reshape(B, C, T).astype(jnp.float32)

    xg = x3.reshape(B, num_groups, -1)
    mean = xg.mean(-1, keepdims=True)
    var = ((xg - mean) ** 2).mean(-1, keepdims=True)
    xn = ((xg - mean) / jnp.sqrt(var + eps)).reshape(B, C, T)
    xn = xn * params["gamma"][None, :, None] + params["beta"][None, :, None]

    qkv = jnp.einsum("oc,bct->bot", params["w_qkv"], xn) \
        + params["b_qkv"][None, :, None]
    H = num_heads
    ch = C // H
    q, k, v = jnp.split(qkv, 3, axis=1)
    q = q.reshape(B * H, ch, T)
    k = k.reshape(B * H, ch, T)
    v = v.reshape(B * H, ch, T)
    scale = 1.0 / math.sqrt(math.sqrt(ch))
    w = jnp.einsum("bct,bcs->bts", q * scale, k * scale)
    w = jax.nn.softmax(w, axis=-1)
    a = jnp.einsum("bts,bcs->bct", w, v).reshape(B, C, T)
    h = jnp.einsum("oc,bct->bot", params["w_proj"], a) \
        + params["b_proj"][None, :, None]
    return (x3 + h).reshape(B, C, Hsp, Wsp)


# ---------------------------------------------------------------------------
# Main
# ---------------------------------------------------------------------------
if __name__ == "__main__":
    # Channels must divide by the 32 GroupNorm groups used by normalization().
    B, C, Hs, Ws = 2, 32, 8, 8          # T = 64 -> padded to 128 inside wrapper
    NUM_HEADS = 4                       # ch = 8
    NUM_GROUPS = 32                     # GroupNorm32(32, channels)

    key = jax.random.PRNGKey(0)
    kx, k1, k2, k3, k4 = jax.random.split(key, 5)

    x = jax.random.normal(kx, (B, C, Hs, Ws), dtype=jnp.float32)

    params = {
        "gamma": jnp.ones((C,), jnp.float32),                 # GroupNorm weight
        "beta": jnp.zeros((C,), jnp.float32),                 # GroupNorm bias
        "w_qkv": 0.05 * jax.random.normal(k1, (3 * C, C), jnp.float32),
        "b_qkv": 0.05 * jax.random.normal(k2, (3 * C,), jnp.float32),
        # zero_module(conv_nd(1, C, C, 1)) -> zero-initialized proj_out
        "w_proj": jnp.zeros((C, C), jnp.float32),
        "b_proj": jnp.zeros((C,), jnp.float32),
    }
    # Non-zero proj weights so the attention path is actually exercised.
    params_nz = dict(params)
    params_nz["w_proj"] = 0.05 * jax.random.normal(k3, (C, C), jnp.float32)
    params_nz["b_proj"] = 0.05 * jax.random.normal(k4, (C,), jnp.float32)

    ok = True

    # 1) zero-init proj (module init state): block is exactly x + 0.
    out = attention_block_forward(x, params, num_heads=NUM_HEADS,
                                  num_groups=NUM_GROUPS)
    out = jax.block_until_ready(out)
    ref = reference_forward(x, params, num_heads=NUM_HEADS,
                            num_groups=NUM_GROUPS)
    ok = ok and bool(jnp.allclose(out, ref, atol=1e-4, rtol=1e-4))

    # 2) non-zero proj, f32 matmul operands.
    ref_nz = reference_forward(x, params_nz, num_heads=NUM_HEADS,
                               num_groups=NUM_GROUPS)
    out_f32 = attention_block_forward(x, params_nz, num_heads=NUM_HEADS,
                                      num_groups=NUM_GROUPS,
                                      param_dtype=jnp.float32)
    out_f32 = jax.block_until_ready(out_f32)
    ok = ok and bool(jnp.allclose(out_f32, ref_nz, atol=1e-2, rtol=1e-2))

    # 3) non-zero proj, default bf16 matmul operands (f32 accumulation).
    out_bf = attention_block_forward(x, params_nz, num_heads=NUM_HEADS,
                                     num_groups=NUM_GROUPS)
    out_bf = jax.block_until_ready(out_bf)
    ok = ok and bool(jnp.allclose(out_bf, ref_nz, atol=5e-2, rtol=5e-2))

    print("KERNEL_OK" if ok else "KERNEL_MISMATCH")
</pallas_src>

<mosaic_0001>
module attributes {stable_mosaic.version = 11 : i64} {
  func.func @attention_block_kernel(%arg0: i32, %arg1: i32, %arg2: memref<1x32x128xf32, #tpu.memory_space<vmem>>, %arg3: memref<32x1xf32, #tpu.memory_space<vmem>>, %arg4: memref<32x1xf32, #tpu.memory_space<vmem>>, %arg5: memref<1x24x32xbf16, #tpu.memory_space<vmem>>, %arg6: memref<1x24x1xf32, #tpu.memory_space<vmem>>, %arg7: memref<1x32x8xbf16, #tpu.memory_space<vmem>>, %arg8: memref<32x1xf32, #tpu.memory_space<vmem>>, %arg9: memref<1x32x128xf32, #tpu.memory_space<vmem>>, %arg10: memref<32x128xbf16, #tpu.memory_space<vmem>>, %arg11: memref<32x128xf32, #tpu.memory_space<vmem>>) attributes {dimension_semantics = [#tpu.dimension_semantics<parallel>, #tpu.dimension_semantics<arbitrary>], iteration_bounds = array<i64: 2, 4>, scalar_prefetch = 0 : i64, scratch_operands = 2 : i64, tpu.core_type = #tpu.core_type<tc>, window_params = [{transform_indices = @transform_0, window_bounds = array<i64: 1, 32, 128>}, {pipeline_mode = #tpu.pipeline_mode<synchronous>, transform_indices = @transform_1, window_bounds = array<i64: 32, 1>}, {pipeline_mode = #tpu.pipeline_mode<synchronous>, transform_indices = @transform_2, window_bounds = array<i64: 32, 1>}, {transform_indices = @transform_3, window_bounds = array<i64: 1, 24, 32>}, {transform_indices = @transform_4, window_bounds = array<i64: 1, 24, 1>}, {transform_indices = @transform_5, window_bounds = array<i64: 1, 32, 8>}, {pipeline_mode = #tpu.pipeline_mode<synchronous>, transform_indices = @transform_6, window_bounds = array<i64: 32, 1>}, {transform_indices = @transform_7, window_bounds = array<i64: 1, 32, 128>}]} {
    %c0_i32 = arith.constant 0 : i32
    %0 = arith.cmpi eq, %arg1, %c0_i32 : i32
    %1 = arith.extui %0 : i1 to i32
    %c0_i32_0 = arith.constant 0 : i32
    %2 = arith.cmpi ne, %1, %c0_i32_0 : i32
    scf.if %2 {
      %c0_22 = arith.constant 0 : index
      %c0_23 = arith.constant 0 : index
      %c0_24 = arith.constant 0 : index
      %47 = vector.load %arg2[%c0_22, %c0_23, %c0_24] : memref<1x32x128xf32, #tpu.memory_space<vmem>>, vector<1x32x128xf32>
      %48 = vector.shape_cast %47 : vector<1x32x128xf32> to vector<32x128xf32>
      %cst_25 = arith.constant dense<0.000000e+00> : vector<32xf32>
      %49 = vector.multi_reduction <add>, %48, %cst_25 [1] : vector<32x128xf32> to vector<32xf32>
      %50 = vector.shape_cast %49 : vector<32xf32> to vector<32x1xf32>
      %51 = arith.mulf %48, %48 : vector<32x128xf32>
      %cst_26 = arith.constant dense<0.000000e+00> : vector<32xf32>
      %52 = vector.multi_reduction <add>, %51, %cst_26 [1] : vector<32x128xf32> to vector<32xf32>
      %53 = vector.shape_cast %52 : vector<32xf32> to vector<32x1xf32>
      %cst_27 = arith.constant dense<0.000000e+00> : vector<32xf32>
      %54 = vector.multi_reduction <add>, %50, %cst_27 [1] : vector<32x1xf32> to vector<32xf32>
      %55 = vector.shape_cast %54 : vector<32xf32> to vector<32x1xf32>
      %cst_28 = arith.constant dense<0.000000e+00> : vector<32xf32>
      %56 = vector.multi_reduction <add>, %53, %cst_28 [1] : vector<32x1xf32> to vector<32xf32>
      %57 = vector.shape_cast %56 : vector<32xf32> to vector<32x1xf32>
      %cst_29 = arith.constant 1.562500e-02 : f32
      %58 = vector.broadcast %cst_29 : f32 to vector<32x1xf32>
      %59 = arith.mulf %55, %58 : vector<32x1xf32>
      %cst_30 = arith.constant 1.562500e-02 : f32
      %60 = vector.broadcast %cst_30 : f32 to vector<32x1xf32>
      %61 = arith.mulf %57, %60 : vector<32x1xf32>
      %62 = arith.mulf %59, %59 : vector<32x1xf32>
      %63 = arith.subf %61, %62 : vector<32x1xf32>
      %cst_31 = arith.constant 0.000000e+00 : f32
      %64 = vector.broadcast %cst_31 : f32 to vector<32x1xf32>
      %65 = arith.maximumf %63, %64 : vector<32x1xf32>
      %cst_32 = arith.constant 9.99999974E-6 : f32
      %66 = vector.broadcast %cst_32 : f32 to vector<32x1xf32>
      %67 = arith.addf %65, %66 : vector<32x1xf32>
      %68 = math.rsqrt %67 : vector<32x1xf32>
      %c0_33 = arith.constant 0 : index
      %c0_34 = arith.constant 0 : index
      %69 = vector.load %arg3[%c0_33, %c0_34] : memref<32x1xf32, #tpu.memory_space<vmem>>, vector<32x1xf32>
      %70 = arith.mulf %68, %69 : vector<32x1xf32>
      %71 = vector.broadcast %59 : vector<32x1xf32> to vector<32x128xf32>
      %72 = arith.subf %48, %71 : vector<32x128xf32>
      %73 = vector.broadcast %70 : vector<32x1xf32> to vector<32x128xf32>
      %74 = arith.mulf %72, %73 : vector<32x128xf32>
      %c0_35 = arith.constant 0 : index
      %c0_36 = arith.constant 0 : index
      %75 = vector.load %arg4[%c0_35, %c0_36] : memref<32x1xf32, #tpu.memory_space<vmem>>, vector<32x1xf32>
      %76 = vector.broadcast %75 : vector<32x1xf32> to vector<32x128xf32>
      %77 = arith.addf %74, %76 : vector<32x128xf32>
      %78 = arith.truncf %77 : vector<32x128xf32> to vector<32x128xbf16>
      %c0_37 = arith.constant 0 : index
      %c0_38 = arith.constant 0 : index
      %79 = vector.load %arg10[%c0_37, %c0_38] : memref<32x128xbf16, #tpu.memory_space<vmem>>, vector<32x128xbf16>
      tpu.vector_store %arg10[%c0_37, %c0_38], %78 {strides = array<i32>} : memref<32x128xbf16, #tpu.memory_space<vmem>>, vector<32x128xbf16>,
      %cst_39 = arith.constant 0.000000e+00 : f32
      %80 = vector.broadcast %cst_39 : f32 to vector<32x128xf32>
      %c0_40 = arith.constant 0 : index
      %c0_41 = arith.constant 0 : index
      %81 = vector.load %arg11[%c0_40, %c0_41] : memref<32x128xf32, #tpu.memory_space<vmem>>, vector<32x128xf32>
      tpu.vector_store %arg11[%c0_40, %c0_41], %80 {strides = array<i32>} : memref<32x128xf32, #tpu.memory_space<vmem>>, vector<32x128xf32>,
    } else {
    }
    %c0 = arith.constant 0 : index
    %c0_1 = arith.constant 0 : index
    %c0_2 = arith.constant 0 : index
    %3 = vector.load %arg5[%c0, %c0_1, %c0_2] : memref<1x24x32xbf16, #tpu.memory_space<vmem>>, vector<1x24x32xbf16>
    %4 = vector.shape_cast %3 : vector<1x24x32xbf16> to vector<24x32xbf16>
    %c0_3 = arith.constant 0 : index
    %c0_4 = arith.constant 0 : index
    %c0_5 = arith.constant 0 : index
    %5 = vector.load %arg6[%c0_3, %c0_4, %c0_5] : memref<1x24x1xf32, #tpu.memory_space<vmem>>, vector<1x24x1xf32>
    %6 = vector.shape_cast %5 : vector<1x24x1xf32> to vector<24x1xf32>
    %c0_6 = arith.constant 0 : index
    %c0_7 = arith.constant 0 : index
    %7 = vector.load %arg10[%c0_6, %c0_7] : memref<32x128xbf16, #tpu.memory_space<vmem>>, vector<32x128xbf16>
    %cst = arith.constant dense<0.000000e+00> : vector<24x128xf32>
    %8 = tpu.matmul %4, %7, %cst {dimension_numbers = #tpu.dot_dimension_numbers<[1], [0], [0], [1], [0, 0, 1, 1], [], []>} : vector<24x32xbf16>, vector<32x128xbf16>, vector<24x128xf32> -> vector<24x128xf32>
    %9 = vector.broadcast %6 : vector<24x1xf32> to vector<24x128xf32>
    %10 = arith.addf %8, %9 : vector<24x128xf32>
    %11 = vector.extract_strided_slice %10 {offsets = [0, 0], sizes = [8, 128], strides = [1, 1]} : vector<24x128xf32> to vector<8x128xf32>
    %12 = arith.truncf %11 : vector<8x128xf32> to vector<8x128xbf16>
    %13 = vector.extract_strided_slice %10 {offsets = [8, 0], sizes = [8, 128], strides = [1, 1]} : vector<24x128xf32> to vector<8x128xf32>
    %14 = arith.truncf %13 : vector<8x128xf32> to vector<8x128xbf16>
    %15 = vector.extract_strided_slice %10 {offsets = [16, 0], sizes = [8, 128], strides = [1, 1]} : vector<24x128xf32> to vector<8x128xf32>
    %16 = arith.truncf %15 : vector<8x128xf32> to vector<8x128xbf16>
    %c0_8 = arith.constant 0 : index
    %c0_9 = arith.constant 0 : index
    %c0_10 = arith.constant 0 : index
    %17 = vector.load %arg7[%c0_8, %c0_9, %c0_10] : memref<1x32x8xbf16, #tpu.memory_space<vmem>>, vector<1x32x8xbf16>
    %18 = vector.shape_cast %17 : vector<1x32x8xbf16> to vector<32x8xbf16>
    %19 = tpu.iota {dimensions = array<i32: 1>} : vector<1x128xi32>
    %c64_i32 = arith.constant 64 : i32
    %20 = vector.broadcast %c64_i32 : i32 to vector<1x128xi32>
    %21 = arith.cmpi slt, %19, %20 : vector<1x128xi32>
    %cst_11 = arith.constant dense<0.000000e+00> : vector<128x128xf32>
    %22 = tpu.matmul %12, %14, %cst_11 {dimension_numbers = #tpu.dot_dimension_numbers<[0], [0], [1], [1], [0, 1, 1, 1], [], []>} : vector<8x128xbf16>, vector<8x128xbf16>, vector<128x128xf32> -> vector<128x128xf32>
    %cst_12 = arith.constant -1.000000e+30 : f32
    %23 = vector.shape_cast %21 : vector<1x128xi1> to vector<1x128xi1>
    %24 = vector.broadcast %23 : vector<1x128xi1> to vector<128x128xi1>
    %25 = vector.broadcast %cst_12 : f32 to vector<128x128xf32>
    %26 = arith.select %24, %22, %25 : vector<128x128xi1>, vector<128x128xf32>
    %cst_13 = arith.constant dense<0xFF800000> : vector<128xf32>
    %27 = vector.multi_reduction <maximumf>, %26, %cst_13 [1] : vector<128x128xf32> to vector<128xf32>
    %28 = vector.shape_cast %27 : vector<128xf32> to vector<128x1xf32>
    %29 = vector.broadcast %28 : vector<128x1xf32> to vector<128x128xf32>
    %30 = arith.subf %26, %29 : vector<128x128xf32>
    %31 = math.exp %30 : vector<128x128xf32>
    %cst_14 = arith.constant dense<0.000000e+00> : vector<128xf32>
    %32 = vector.multi_reduction <add>, %31, %cst_14 [1] : vector<128x128xf32> to vector<128xf32>
    %33 = vector.shape_cast %32 : vector<128xf32> to vector<128x1xf32>
    %34 = tpu.reciprocal %33 {approx = true} : vector<128x1xf32> -> vector<128x1xf32>
    %35 = vector.broadcast %34 : vector<128x1xf32> to vector<128x128xf32>
    %36 = arith.mulf %31, %35 : vector<128x128xf32>
    %37 = arith.truncf %36 : vector<128x128xf32> to vector<128x128xbf16>
    %cst_15 = arith.constant dense<0.000000e+00> : vector<128x8xf32>
    %38 = tpu.matmul %37, %16, %cst_15 {dimension_numbers = #tpu.dot_dimension_numbers<[1], [1], [0], [0], [0, 0, 1, 0], [], []>} : vector<128x128xbf16>, vector<8x128xbf16>, vector<128x8xf32> -> vector<128x8xf32>
    %c0_16 = arith.constant 0 : index
    %c0_17 = arith.constant 0 : index
    %39 = vector.load %arg11[%c0_16, %c0_17] : memref<32x128xf32, #tpu.memory_space<vmem>>, vector<32x128xf32>
    %40 = arith.truncf %38 : vector<128x8xf32> to vector<128x8xbf16>
    %cst_18 = arith.constant dense<0.000000e+00> : vector<32x128xf32>
    %41 = tpu.matmul %18, %40, %cst_18 {dimension_numbers = #tpu.dot_dimension_numbers<[1], [1], [0], [0], [0, 0, 1, 0], [], []>} : vector<32x8xbf16>, vector<128x8xbf16>, vector<32x128xf32> -> vector<32x128xf32>
    %42 = arith.addf %39, %41 : vector<32x128xf32>
    %c0_19 = arith.constant 0 : index
    %c0_20 = arith.constant 0 : index
    %43 = vector.load %arg11[%c0_19, %c0_20] : memref<32x128xf32, #tpu.memory_space<vmem>>, vector<32x128xf32>
    tpu.vector_store %arg11[%c0_19, %c0_20], %42 {strides = array<i32>} : memref<32x128xf32, #tpu.memory_space<vmem>>, vector<32x128xf32>,
    %c3_i32 = arith.constant 3 : i32
    %44 = arith.cmpi eq, %arg1, %c3_i32 : i32
    %45 = arith.extui %44 : i1 to i32
    %c0_i32_21 = arith.constant 0 : i32
    %46 = arith.cmpi ne, %45, %c0_i32_21 : i32
    scf.if %46 {
      %c0_22 = arith.constant 0 : index
      %c0_23 = arith.constant 0 : index
      %c0_24 = arith.constant 0 : index
      %47 = vector.load %arg2[%c0_22, %c0_23, %c0_24] : memref<1x32x128xf32, #tpu.memory_space<vmem>>, vector<1x32x128xf32>
      %48 = vector.shape_cast %47 : vector<1x32x128xf32> to vector<32x128xf32>
      %c0_25 = arith.constant 0 : index
      %c0_26 = arith.constant 0 : index
      %49 = vector.load %arg11[%c0_25, %c0_26] : memref<32x128xf32, #tpu.memory_space<vmem>>, vector<32x128xf32>
      %50 = arith.addf %48, %49 : vector<32x128xf32>
      %c0_27 = arith.constant 0 : index
      %c0_28 = arith.constant 0 : index
      %51 = vector.load %arg8[%c0_27, %c0_28] : memref<32x1xf32, #tpu.memory_space<vmem>>, vector<32x1xf32>
      %52 = vector.broadcast %51 : vector<32x1xf32> to vector<32x128xf32>
      %53 = arith.addf %50, %52 : vector<32x128xf32>
      %c0_29 = arith.constant 0 : index
      %c0_30 = arith.constant 0 : index
      %c0_31 = arith.constant 0 : index
      %54 = vector.load %arg9[%c0_29, %c0_30, %c0_31] : memref<1x32x128xf32, #tpu.memory_space<vmem>>, vector<1x32x128xf32>
      %55 = vector.shape_cast %54 : vector<1x32x128xf32> to vector<32x128xf32>
      %56 = vector.shape_cast %53 : vector<32x128xf32> to vector<1x32x128xf32>
      tpu.vector_store %arg9[%c0_29, %c0_30, %c0_31], %56 {strides = array<i32>} : memref<1x32x128xf32, #tpu.memory_space<vmem>>, vector<1x32x128xf32>,
    } else {
    }
    return
  }
  func.func @transform_0(%arg0: i32, %arg1: i32) -> (i32, i32, i32) {
    %c0_i32 = arith.constant 0 : i32
    %c0_i32_0 = arith.constant 0 : i32
    %c0_i32_1 = arith.constant 0 : i32
    return %arg0, %c0_i32, %c0_i32_0 : i32, i32, i32
  }
  func.func @transform_1(%arg0: i32, %arg1: i32) -> (i32, i32) {
    %c0_i32 = arith.constant 0 : i32
    %c0_i32_0 = arith.constant 0 : i32
    %c0_i32_1 = arith.constant 0 : i32
    return %c0_i32, %c0_i32_0 : i32, i32
  }
  func.func @transform_2(%arg0: i32, %arg1: i32) -> (i32, i32) {
    %c0_i32 = arith.constant 0 : i32
    %c0_i32_0 = arith.constant 0 : i32
    %c0_i32_1 = arith.constant 0 : i32
    return %c0_i32, %c0_i32_0 : i32, i32
  }
  func.func @transform_3(%arg0: i32, %arg1: i32) -> (i32, i32, i32) {
    %c0_i32 = arith.constant 0 : i32
    %c0_i32_0 = arith.constant 0 : i32
    %c0_i32_1 = arith.constant 0 : i32
    return %arg1, %c0_i32, %c0_i32_0 : i32, i32, i32
  }
  func.func @transform_4(%arg0: i32, %arg1: i32) -> (i32, i32, i32) {
    %c0_i32 = arith.constant 0 : i32
    %c0_i32_0 = arith.constant 0 : i32
    %c0_i32_1 = arith.constant 0 : i32
    return %arg1, %c0_i32, %c0_i32_0 : i32, i32, i32
  }
  func.func @transform_5(%arg0: i32, %arg1: i32) -> (i32, i32, i32) {
    %c0_i32 = arith.constant 0 : i32
    %c0_i32_0 = arith.constant 0 : i32
    %c0_i32_1 = arith.constant 0 : i32
    return %arg1, %c0_i32, %c0_i32_0 : i32, i32, i32
  }
  func.func @transform_6(%arg0: i32, %arg1: i32) -> (i32, i32) {
    %c0_i32 = arith.constant 0 : i32
    %c0_i32_0 = arith.constant 0 : i32
    %c0_i32_1 = arith.constant 0 : i32
    return %c0_i32, %c0_i32_0 : i32, i32
  }
  func.func @transform_7(%arg0: i32, %arg1: i32) -> (i32, i32, i32) {
    %c0_i32 = arith.constant 0 : i32
    %c0_i32_0 = arith.constant 0 : i32
    %c0_i32_1 = arith.constant 0 : i32
    return %arg0, %c0_i32, %c0_i32_0 : i32, i32, i32
  }
}

</mosaic_0001>

<bundles_post_ra>
// kernel: tpu_custom_call.1
= control target key start
LH: loop header
LB: loop body
LE: loop exit
PB: predicated region body
PF: predicated region fallthrough
CT: control target
= control target key end

     0   :  { %12 = vsyncpa [#allocation5], 0  ;;  %s2127_s0 = inlined_call_operand.vmem [shape: f32[2,32,128], index: 0, kind: input, shape index: {}]   ;;  %s2128_s1 = inlined_call_operand.vmem [shape: f32[32,1], index: 1, kind: input, shape index: {}]   ;;  %s2129_s2 = inlined_call_operand.vmem [shape: f32[32,1], index: 2, kind: input, shape index: {}]   ;;  %s2130_s3 = inlined_call_operand.vmem [shape: bf16[4,24,32], index: 3, kind: input, shape index: {}]   ;;  %s2131_s4 = inlined_call_operand.vmem [shape: f32[4,24,1], index: 4, kind: input, shape index: {}]   ;;  %s2132_s5 = inlined_call_operand.vmem [shape: bf16[4,32,8], index: 5, kind: input, shape index: {}]   ;;  %s2133_s6 = inlined_call_operand.vmem [shape: f32[32,1], index: 6, kind: input, shape index: {}]   ;;  %s2134_s7 = inlined_call_operand.hbm [shape: f32[2,32,128], index: 7, kind: output, shape index: {}]  }
   0x1   :  { %14 = vsyncpa [#allocation5 + $0x1], 0  ;;  %s1718_s24 = smov 0   ;;  %s1720_s25 = smov 0  }
   0x2   :  { %s1722_s26 = smov 0   ;;  %s1724_s27 = smov 0  }
   0x3   :  { %s1726_s28 = smov 0   ;;  %s1728_s29 = smov 0  }
   0x4   :  { %s1730_s30 = smov 0   ;;  %s1732_s8 = smov 0  }
   0x5 LB: > { %2142 = sst [smem:[#allocation7_spill]] %s1641_s24  ;;  %s1271_s9 = sadd.s32 4294967295, %s1669_s8   ;;  %s1669_s8 = sphi %s1732_s8, %s20_s8   ;;  %s1665_s30 = sphi %s1730_s30, %s2160_s30   ;;  %s1661_s29 = sphi %s1728_s29, %s2159_s29   ;;  %s1657_s28 = sphi %s1726_s28, %s2158_s28   ;;  %s1653_s27 = sphi %s1724_s27, %s2157_s27   ;;  %s1649_s26 = sphi %s1722_s26, %s2156_s26   ;;  %s1645_s25 = sphi %s1720_s25, %s2162_s25   ;;  %s1641_s24 = sphi %s1718_s24, %s2161_s24  }
   0x6   : > { %2143 = sst [smem:[#allocation8_spill]] %s1649_s26  ;;  %s1272_s10 = sadd.s32 4294967294, %s1669_s8  }
   0x7   : > { %2144 = sst [smem:[#allocation9_spill]] %s1661_s29  ;;  %s29_s11 = sadd.s32 1, %s1661_s29 }
   0x8   : > { %2145 = sst [smem:[#allocation10_spill]] %s1665_s30  ;;  %p30_p0 = scmp.ge.s32.totalorder %s29_s11, 4 }
   0x9   : > { %s32_s12 = sadd.s32 1, %s1665_s30  ;;  %p216_p1 = scmp.ne.s32.totalorder %s1649_s26, %s1645_s25 }
   0xa   : > { %p217_p2 = scmp.eq.s32.totalorder %s1271_s9, 7  ;;  %s2164_s11 = smov (%p30_p0, %s29_s11), 0 }
   0xb   : > { %2146 = sst [smem:[#allocation11_spill]] %s2164_s11  ;;  %s2166_s12 = smov (!%p30_p0, %s32_s12), %s1665_s30 }
   0xc   : > { %p1767_p3 = por %p217_p2, %p216_p1  ;;  %p222_p4 = scmp.ne.s32.totalorder %s1645_s25, %s1641_s24 }
   0xd   : > { %p34_p5 = scmp.ge.s32.totalorder %s2166_s12, 2  ;;  %p223_p6 = scmp.eq.s32.totalorder %s1272_s10, 7 }
   0xe   : > { %p1275_p7 = scmp.ge.s32.totalorder %s1669_s8, 1  ;;  %p282_p8 = scmp.lt.s32.totalorder %s1669_s8, 9 }
   0xf   : > { %s2168_s12 = smov (%p34_p5, %s2166_s12), 0  ;;  %p1777_p9 = por %p223_p6, %p222_p4 }
  0x10   : > { %2148 = sst [smem:[#allocation12_spill]] %s2168_s12  ;;  %p283_p10 = pnand %p1275_p7, %p282_p8 }
  0x11   : > { %s2149_s14 = scalar_select %p1777_p9, 1, 0 }
  0x12   : > { %s203_s15 = ssub.s32 %s1665_s30, %s2168_s12  ;;  %s206_s16 = sadd.s32 1, %s1649_s26 }
  0x13   : > { %2150 = sst [smem:[#allocation13_spill]] %s2149_s14  ;;  %p204_p11 = scmp.eq.s32.totalorder %s203_s15, 0 }
  0x14   : > { %286 = sbr.rel (%p283_p10) target bundleno = 1773 (0x6ed), region = 48  ;;  %s2139_s18 = sand.u32 (!%p283_p10), 1, %s1645_s25  }
  0x15   : > { %s1785_s17 = scalar_select %p204_p11, %s1649_s26, %s206_s16  }
  0x16   : > { %p329_p12 = scmp.lt.s32.totalorder (!%p283_p10), %s1657_s28, 1  ;;  %s1276_s19 = sshll.u32 (!%p283_p10), %s2139_s18, 5 }
  0x17   : > { %2151 = sst [smem:[#allocation14_spill]] %s1785_s17  ;;  %p334_p13 = scmp.lt.s32.totalorder (!%p283_p10), %s1653_s27, 3 }
  0x18   : > { %p1283_p0 = scmp.ne.s32.totalorder (!%p283_p10), %s1653_s27, 0 }
  0x1b   : > { %s330_s20 = scalar_select %p329_p12, %s1657_s28, 1 }
  0x1c   : > { %s335_s21 = scalar_select %p334_p13, %s1653_s27, 3 }
  0x1d   : > { %s1306_s22 = sshll.u32 %s330_s20, 5  ;;  %353 = sbr.rel (%p1283_p0) target bundleno = 348 (0x15c), region = 52  ;;  %v1671_v8 = vmov (!%p1283_p0), 0   ;;  %v450_v9 = vld [vmem:[%s2129_s2] sm:$0xff] (!%p1283_p0)  ;;  %v451_v10 = vld [vmem:[%s2129_s2 + $0x8] sm:$0xff] (!%p1283_p0)  ;;  %v452_v11 = vld [vmem:[%s2129_s2 + $0x10] sm:$0xff] (!%p1283_p0) }
  0x1e   : > { %s1797_s10 = scalar_lea.vmem %s2127_s0, %s1306_s22  ;;  %s1414_s15 = smul.u32 12, %s335_s21  ;;  %1494 = vset.pattern.permute.xlu1 (!%p1283_p0), %v1671_v8  ;;  %1493 = vset.pattern.permute.xlu0 (!%p1283_p0), %v1671_v8  ;;  %v415_v44 = vld [vmem:[%s2128_s1 + $0x8] sm:$0xff] (!%p1283_p0)  ;;  %v414_v45 = vld [vmem:[%s2128_s1] sm:$0xff] (!%p1283_p0)  ;;  %v416_v50 = vld [vmem:[%s2128_s1 + $0x10] sm:$0xff] (!%p1283_p0)  ;;  %v1672_v57 = vmov (!%p1283_p0), 0.0  }
  0x1f   : > { %s1415_s16 = smul.u32 24, %s335_s21  ;;  %s1307_s12 = sshll.u32 %s335_s21, 4  ;;  %v1818_v0 = vld [vmem:[%s1797_s10 + $0x10] sm:$0xff] (!%p1283_p0)  ;;  %v1821_v1 = vld [vmem:[%s1797_s10] sm:$0xff] (!%p1283_p0)  ;;  %v1826_v2 = vld [vmem:[%s1797_s10 + $0x18] sm:$0xff] (!%p1283_p0)  ;;  %482 = vst [vmem:[#allocation3] sm:$0xff] (!%p1283_p0), %v1672_v57 }
  0x20   : > { %s1802_s29 = scalar_lea.vmem %s2130_s3, %s1414_s15  ;;  %s1807_s18 = scalar_lea.vmem %s2132_s5, %s1307_s12  ;;  %362 = vadd.xlane.f32.xlu1 (!%p1283_p0), %v1818_v0  ;;  %358 = vadd.xlane.f32.xlu0 (!%p1283_p0), %v1821_v1  ;;  %v1829_v3 = vld [vmem:[%s1797_s10 + $0x8] sm:$0xff] (!%p1283_p0)  ;;  %v366_v5 = vmul.f32 (!%p1283_p0), %v1821_v1, %v1821_v1  ;;  %v369_v6 = vmul.f32 (!%p1283_p0), %v1826_v2, %v1826_v2  ;;  %v368_v7 = vmul.f32 (!%p1283_p0), %v1818_v0, %v1818_v0  ;;  %v417_v54 = vld [vmem:[%s2128_s1 + $0x18] sm:$0xff] (!%p1283_p0) }
  0x21   : > { %s1812_s24 = scalar_lea.vmem %s2131_s4, %s1415_s16  ;;  %s1814_s22 = scalar_lea.vmem [#allocation4], %s1276_s19  ;;  %v367_v4 = vmul.f32 (!%p1283_p0), %v1829_v3, %v1829_v3  ;;  %v453_v56 = vld [vmem:[%s2129_s2 + $0x18] sm:$0xff] (!%p1283_p0)  ;;  %483 = vst [vmem:[#allocation3 + $0x8] sm:$0xff] (!%p1283_p0), %v1672_v57  ;;  %484 = vst [vmem:[#allocation3 + $0x10] sm:$0xff] (!%p1283_p0), %v1672_v57 }
  0x22   : > { %485 = vst [vmem:[#allocation3 + $0x18] sm:$0xff] (!%p1283_p0), %v1672_v57 }
  0x24   : > { %364 = vadd.xlane.f32.xlu1 %v1826_v2  ;;  %360 = vadd.xlane.f32.xlu0 %v1829_v3 }
  0x28   : > { %372 = vadd.xlane.f32.xlu1 %v367_v4  ;;  %370 = vadd.xlane.f32.xlu0 %v366_v5 }
  0x2c   : > { %376 = vadd.xlane.f32.xlu1 %v369_v6  ;;  %374 = vadd.xlane.f32.xlu0 %v368_v7 }
  0x3d   : > { %456 = vperm.xlu1 %1494, %v450_v9  }
  0x41   : > { %461 = vperm.xlu1 %1494, %v451_v10  }
  0x45   : > { %466 = vperm.xlu1 %1494, %v452_v11  }
  0xad   : > { %v363_v12 = vpop.xlane.xlu1 %362  ;;  %v359_v13 = vpop.xlane.xlu0 %358 }
  0xae   : > { %v1850_v16 = vmul.f32 0.015625, %v359_v13  ;;  %v1852_v18 = vmul.f32 0.015625, %v363_v12 }
  0xb0   : > { %v394_v22 = vmul.f32 %v1850_v16, %v1850_v16  ;;  %v396_v28 = vmul.f32 %v1852_v18, %v1852_v18  ;;  %v422_v63 = vsub.f32 %v1821_v1, %v1850_v16  ;;  %v424_v11 = vsub.f32 %v1818_v0, %v1852_v18 }
  0xb1   : > { %v365_v14 = vpop.xlane.xlu1 %364  ;;  %v361_v15 = vpop.xlane.xlu0 %360 }
  0xb2   : > { %v387_v17 = vmul.f32 0.015625, %v361_v15  ;;  %v1854_v19 = vmul.f32 0.015625, %v365_v14 }
  0xb4   : > { %v395_v23 = vmul.f32 %v387_v17, %v387_v17  ;;  %v397_v29 = vmul.f32 %v1854_v19, %v1854_v19  ;;  %v423_v61 = vsub.f32 %v1829_v3, %v387_v17  ;;  %v425_v3 = vsub.f32 %v1826_v2, %v1854_v19 }
  0xb5   : > { %v373_v20 = vpop.xlane.xlu1 %372  ;;  %v371_v21 = vpop.xlane.xlu0 %370 }
  0xb6   : > { %v391_v24 = vmul.f32 0.015625, %v373_v20  ;;  %v390_v25 = vmul.f32 0.015625, %v371_v21 }
  0xb8   : > { %v399_v26 = vsub.f32 %v391_v24, %v395_v23  ;;  %v398_v27 = vsub.f32 %v390_v25, %v394_v22 }
  0xb9   : > { %v377_v30 = vpop.xlane.xlu1 %376  ;;  %v375_v31 = vpop.xlane.xlu0 %374 }
  0xba   : > { %v403_v32 = vmax.f32 %v399_v26, 0.0  ;;  %v402_v33 = vmax.f32 %v398_v27, 0.0  ;;  %v393_v34 = vmul.f32 0.015625, %v377_v30  ;;  %v392_v35 = vmul.f32 0.015625, %v375_v31 }
  0xbc   : > { %v407_v36 = vadd.f32 1e-05, %v403_v32  ;;  %v406_v37 = vadd.f32 1e-05, %v402_v33  ;;  %v401_v38 = vsub.f32 %v393_v34, %v397_v29  ;;  %v400_v39 = vsub.f32 %v392_v35, %v396_v28 }
  0xbd   : > { %v457_v58 = vpop.permute.xlu1 %456 }
  0xbe   : > { %1495 = vrsqrt.f32 %v407_v36  ;;  %v405_v40 = vmax.f32 %v401_v38, 0.0  ;;  %v404_v41 = vmax.f32 %v400_v39, 0.0 }
  0xbf   : > { %1497 = vrsqrt.f32 %v406_v37 }
  0xc0   : > { %v408_v42 = vadd.f32 1e-05, %v404_v41  ;;  %v409_v43 = vadd.f32 1e-05, %v405_v40 }
  0xc1   : > { %v462_v59 = vpop.permute.xlu1 %461 }
  0xc2   : > { %1499 = vrsqrt.f32 %v408_v42 }
  0xc3   : > { %1501 = vrsqrt.f32 %v409_v43 }
  0xc5   : > { %v467_v60 = vpop.permute.xlu1 %466 }
  0xc8   : > { %v1496_v46 = vpop.eup %1495 }
  0xc9   : > { %v1498_v47 = vpop.eup %1497  ;;  %v419_v48 = vmul.f32 %v1496_v46, %v415_v44 }
  0xca   : > { %v418_v49 = vmul.f32 %v1498_v47, %v414_v45 }
  0xcb   : > { %433 = vperm.xlu1 %1494, %v419_v48  }
  0xcc   : > { %428 = vperm.xlu0 %1493, %v418_v49   ;;  %v1500_v51 = vpop.eup %1499 }
  0xcd   : > { %v420_v52 = vmul.f32 %v1500_v51, %v416_v50  ;;  %v1502_v53 = vpop.eup %1501 }
  0xce   : > { %v421_v55 = vmul.f32 %v1502_v53, %v417_v54 }
  0xcf   : > { %438 = vperm.xlu1 %1494, %v420_v52  }
  0xd3   : > { %443 = vperm.xlu1 %1494, %v421_v55  }
  0xd7   : > { %471 = vperm.xlu1 %1494, %v453_v56  }
 0x14a   : > { %v434_v62 = vpop.permute.xlu1 %433 }
 0x14b   : > { %v447_v4 = vmul.f32 %v434_v62, %v423_v61  ;;  %v429_v5 = vpop.permute.xlu0 %428 }
 0x14c   : > { %v446_v6 = vmul.f32 %v429_v5, %v422_v63 }
 0x14d   : > { %v475_v7 = vadd.f32 %v462_v59, %v447_v4 }
 0x14e   : > { %v474_v8 = vadd.f32 %v457_v58, %v446_v6  ;;  %v439_v9 = vpop.permute.xlu1 %438 }
 0x14f   : > { %v448_v13 = vmul.f32 %v439_v9, %v424_v11 }
 0x150   : > { %v478_v10 = vpack.c.bf16 %v475_v7, %v474_v8 }
 0x151   : > { %v476_v17 = vadd.f32 %v467_v60, %v448_v13 }
 0x152   : > { %480 = vst [vmem:[#allocation2] sm:$0xff] %v478_v10  ;;  %v444_v12 = vpop.permute.xlu1 %443 }
 0x153   : > { %v449_v14 = vmul.f32 %v444_v12, %v425_v3 }
 0x156   : > { %v472_v15 = vpop.permute.xlu1 %471 }
 0x157   : > { %v477_v1 = vadd.f32 %v472_v15, %v449_v14 }
 0x159   : > { %v479_v16 = vpack.c.bf16 %v477_v1, %v476_v17 }
 0x15b   : > { %481 = vst [vmem:[#allocation2 + $0x8] sm:$0xff] %v479_v16 }
 0x15c PF: > { %v492_v20 = vld [vmem:[#allocation2] sm:$0xff]  ;;  %vm517_vm0 = vcmask 261120   ;;  %v1673_v18 = vmov 0   ;;  %v1506_v19 = vld [vmem:[%s1802_s29 + $0x8] ss:$0 sps:$4 sm:$0xff]   ;;  %vm623_vm1 = vcmask 1043456   ;;  %v579_v42 = vlaneseq }
 0x15d   : > { %1341 = vmatprep.subr.bf16.mxu0 %v492_v20  ;;  %v1505_v0 = vld [vmem:[%s1802_s29] sm:$0xff]   ;;  %1503 = vset.pattern.permute.xlu0 %v1673_v18  ;;  %v490_v22 = vld [vmem:[%s1812_s24 + $0x8] sm:$0xff]  ;;  %vm598_vm2 = vcmask 64512   ;;  %p1300_p1 = scmp.ne.s32.totalorder %s1653_s27, 3 }
 0x15e   : > { %1342 = vmatpush3.bf16.msra.mxu0 %v492_v20  ;;  %v489_v2 = vld [vmem:[%s1812_s24] sm:$0xff]  ;;  %1345 = vmatprep.mubr.msk.bf16.mxu0 %vm517_vm0, %v1505_v0  ;;  %v580_v43 = vand.u32 127, %v579_v42 }
 0x15f   : > { %496 = vperm.xlu0 %1503, %v489_v2  }
 0x160   : > { %vm581_vm3 = vcmp.lt.s32.totalorder %v580_v43, 64 }
 0x162   : > { %v493_v21 = vld [vmem:[#allocation2 + $0x8] sm:$0xff] }
 0x163   : > { %1343 = vmatprep.subr.bf16.mxu0 %v493_v21  ;;  %501 = vperm.xlu0 %1503, %v490_v22  }
 0x164   : > { %1344 = vmatpush3.bf16.msra.mxu0 %v493_v21 }
 0x167   : > { %1346 = vmatmul.mubr.msk.bf16.vlgmr.msra.gmra.mrb[0].mxu0 %vm517_vm0, %v1506_v19 }
 0x1de   : > { %v497_v23 = vpop.permute.xlu0 %496 }
 0x1e2   : > { %v502_v28 = vpop.permute.xlu0 %501 }
 0x23a   : > { %v1888_v24 = vpop.f32.mrb[0].mxu0 }
 0x23b   : > { %v558_v25 = vpop.f32.mrb[1].mxu0 }
 0x23c   : > { %v1348_v26 = vpop.f32.mrb[2].mxu0  ;;  %v559_v27 = vadd.f32 %v558_v25, %v497_v23 }
 0x23d   : > { %v561_v29 = vpop.f32.mrb[3].mxu0 }
 0x23e   : > { %v562_v30 = vadd.f32 %v561_v29, %v502_v28  ;;  %v572_v31 = vpack.c.bf16 %v559_v27, %v559_v27 }
 0x240   : > { %v573_v32 = vpack.c.bf16 %v562_v30, %v562_v30  ;;  %582 = vxpose.xlu1.c.b16.start.end [1/1] (short) %v572_v31, 128 }
 0x242   : > { %1405 = vmatprep.subr.msk.bf16.mxu1 %vm623_vm1, %v573_v32  ;;  %v625_v33 = vsel %vm623_vm1, %v573_v32, 0 }
 0x243   : > { %1350 = vmatpush3.bf16.msra.mxu1 %v625_v33 }
 0x244   : > { %1504 = vset.pattern.permute.xlu1 %v1673_v18 }
 0x2a6   : > { %v590_v34 = vpop.trf.xlu1 }
 0x2a7   : > { %1351 = vmatprep.mubr.msk.bf16.mxu1 %vm598_vm2, %v590_v34 }
 0x2aa   : > { %v591_v35 = vpop.trf.xlu1 }
 0x2ab   : > { %1352 = vmatmul.mubr.msk.bf16.vlgmr.msra.gmra.mrb[0].mxu1 %vm598_vm2, %v591_v35 }
 0x2ae   : > { %v592_v36 = vpop.trf.xlu1 }
 0x2af   : > { %1355 = vmatprep.mubr.msk.bf16.mxu1 %vm598_vm2, %v592_v36 }
 0x2b2   : > { %v593_v37 = vpop.trf.xlu1 }
 0x2b3   : > { %1356 = vmatmul.mubr.msk.bf16.gmra.mrb[4].mxu1 %vm598_vm2, %v593_v37 }
 0x2b6   : > { %v594_v38 = vpop.trf.xlu1 }
 0x2b7   : > { %1359 = vmatprep.mubr.msk.bf16.mxu1 %vm598_vm2, %v594_v38 }
 0x2ba   : > { %v595_v39 = vpop.trf.xlu1 }
 0x2bb   : > { %1360 = vmatmul.mubr.msk.bf16.gmra.mrb[8].mxu1 %vm598_vm2, %v595_v39 }
 0x2be   : > { %v596_v40 = vpop.trf.xlu1 }
 0x2bf   : > { %1363 = vmatprep.mubr.msk.bf16.mxu1 %vm598_vm2, %v596_v40 }
 0x2c2   : > { %v597_v41 = vpop.trf.xlu1 }
 0x2c3   : > { %1364 = vmatmul.mubr.msk.bf16.gmra.mrb[12].mxu1 %vm598_vm2, %v597_v41 }
 0x37e   : > { %v1353_v44 = vpop.f32.mrb[0].mxu1 }
 0x37f   : > { %v661_v45 = vpop.f32.mrb[1].mxu1  ;;  %v728_v46 = vsel %vm581_vm3, %v1353_v44, -1e+30 }
 0x380   : > { %746 = vmax.xlane.f32.xlu0 %v728_v46  ;;  %v1354_v47 = vpop.f32.mrb[2].mxu1  ;;  %v726_v48 = vsel %vm581_vm3, %v661_v45, -1e+30 }
 0x381   : > { %742 = vmax.xlane.f32.xlu1 %v726_v48  ;;  %v664_v49 = vpop.f32.mrb[3].mxu1  ;;  %v729_v53 = vsel %vm581_vm3, %v1354_v47, -1e+30 }
 0x382   : > { %v727_v50 = vsel %vm581_vm3, %v664_v49, -1e+30 }
 0x384   : > { %744 = vmax.xlane.f32.xlu0 %v727_v50 }
 0x386   : > { %v1357_v51 = vpop.f32.mrb[4].mxu1 }
 0x387   : > { %v677_v52 = vpop.f32.mrb[5].mxu1  ;;  %v732_v58 = vsel %vm581_vm3, %v1357_v51, -1e+30 }
 0x388   : > { %748 = vmax.xlane.f32.xlu0 %v729_v53  ;;  %v730_v54 = vsel %vm581_vm3, %v677_v52, -1e+30  ;;  %v1358_v55 = vpop.f32.mrb[6].mxu1 }
 0x389   : > { %750 = vmax.xlane.f32.xlu1 %v730_v54  ;;  %v680_v56 = vpop.f32.mrb[7].mxu1  ;;  %v1909_v59 = vsel %vm581_vm3, %v1358_v55, -1e+30 }
 0x38a   : > { %v1904_v57 = vsel %vm581_vm3, %v680_v56, -1e+30 }
 0x38c   : > { %752 = vmax.xlane.f32.xlu0 %v1904_v57 }
 0x38d   : > { %754 = vmax.xlane.f32.xlu1 %v732_v58 }
 0x38e   : > { %v1361_v60 = vpop.f32.mrb[8].mxu1 }
 0x38f   : > { %v693_v61 = vpop.f32.mrb[9].mxu1  ;;  %v1920_v6 = vsel %vm581_vm3, %v1361_v60, -1e+30 }
 0x390   : > { %756 = vmax.xlane.f32.xlu0 %v1909_v59  ;;  %v1913_v62 = vsel %vm581_vm3, %v693_v61, -1e+30  ;;  %v1362_v63 = vpop.f32.mrb[10].mxu1 }
 0x391   : > { %758 = vmax.xlane.f32.xlu1 %v1913_v62  ;;  %v696_v4 = vpop.f32.mrb[11].mxu1  ;;  %v1925_v7 = vsel %vm581_vm3, %v1362_v63, -1e+30 }
 0x392   : > { %v1917_v5 = vsel %vm581_vm3, %v696_v4, -1e+30 }
 0x394   : > { %760 = vmax.xlane.f32.xlu0 %v1917_v5 }
 0x395   : > { %762 = vmax.xlane.f32.xlu1 %v1920_v6 }
 0x396   : > { %v1365_v8 = vpop.f32.mrb[12].mxu1 }
 0x397   : > { %v709_v9 = vpop.f32.mrb[13].mxu1  ;;  %v1936_v3 = vsel %vm581_vm3, %v1365_v8, -1e+30 }
 0x398   : > { %764 = vmax.xlane.f32.xlu0 %v1925_v7  ;;  %v1929_v10 = vsel %vm581_vm3, %v709_v9, -1e+30  ;;  %v1366_v11 = vpop.f32.mrb[14].mxu1 }
 0x399   : > { %766 = vmax.xlane.f32.xlu1 %v1929_v10  ;;  %v712_v12 = vpop.f32.mrb[15].mxu1  ;;  %v1941_v14 = vsel %vm581_vm3, %v1366_v11, -1e+30 }
 0x39a   : > { %v1933_v13 = vsel %vm581_vm3, %v712_v12, -1e+30 }
 0x39c   : > { %768 = vmax.xlane.f32.xlu0 %v1933_v13 }
 0x39d   : > { %770 = vmax.xlane.f32.xlu1 %v1936_v3 }
 0x3a0   : > { %772 = vmax.xlane.f32.xlu0 %v1941_v14 }
 0x40d   : > { %v747_v15 = vpop.xlane.xlu0 %746 }
 0x40e   : > { %v776_v17 = vsub.f32 %v728_v46, %v747_v15  ;;  %v743_v1 = vpop.xlane.xlu1 %742 }
 0x40f   : > { %v774_v16 = vsub.f32 %v726_v48, %v743_v1 }
 0x410   : > { %v794_v20 = vmul.f32 1.442695, %v776_v17 }
 0x411   : > { %v790_v21 = vmul.f32 1.442695, %v774_v16  ;;  %v745_v0 = vpop.xlane.xlu0 %744 }
 0x412   : > { %1509 = vpow2.f32 %v794_v20  ;;  %v775_v18 = vsub.f32 %v727_v50, %v745_v0 }
 0x413   : > { %1511 = vpow2.f32 %v790_v21 }
 0x414   : > { %v792_v2 = vmul.f32 1.442695, %v775_v18 }
 0x415   : > { %v749_v19 = vpop.xlane.xlu0 %748 }
 0x416   : > { %1513 = vpow2.f32 %v792_v2  ;;  %v777_v22 = vsub.f32 %v729_v53, %v749_v19  ;;  %v751_v23 = vpop.xlane.xlu1 %750  ;;  %v491_v53 = vld [vmem:[%s1812_s24 + $0x10] sm:$0xff] }
 0x417   : > { %v778_v28 = vsub.f32 %v730_v54, %v751_v23 }
 0x418   : > { %v796_v25 = vmul.f32 1.442695, %v777_v22 }
 0x419   : > { %v753_v26 = vpop.xlane.xlu0 %752  ;;  %v798_v34 = vmul.f32 1.442695, %v778_v28 }
 0x41a   : > { %1515 = vpow2.f32 %v796_v25  ;;  %v755_v27 = vpop.xlane.xlu1 %754  ;;  %v779_v35 = vsub.f32 %v1904_v57, %v753_v26 }
 0x41b   : > { %v780_v29 = vsub.f32 %v732_v58, %v755_v27 }
 0x41c   : > { %v1944_v30 = vpop.eup %1509  ;;  %v800_v38 = vmul.f32 1.442695, %v779_v35 }
 0x41d   : > { %v802_v31 = vmul.f32 1.442695, %v780_v29  ;;  %826 = vadd.xlane.f32.xlu1 %v1944_v30  ;;  %v1949_v33 = vpop.eup %1511  ;;  %v757_v37 = vpop.xlane.xlu0 %756 }
 0x41e   : > { %v1947_v32 = vpop.xlane.xlu1 %758  ;;  %v781_v39 = vsub.f32 %v1909_v59, %v757_v37 }
 0x41f   : > { %1517 = vpow2.f32 %v802_v31 }
 0x420   : > { %v1952_v36 = vpop.eup %1513  ;;  %1519 = vpow2.f32 %v798_v34  ;;  %v804_v43 = vmul.f32 1.442695, %v781_v39 }
 0x421   : > { %824 = vadd.xlane.f32.xlu0 %v1952_v36  ;;  %822 = vadd.xlane.f32.xlu1 %v1949_v33  ;;  %v761_v42 = vpop.xlane.xlu0 %760  ;;  %1521 = vpow2.f32 %v800_v38 }
 0x422   : > { %v763_v41 = vpop.xlane.xlu1 %762  ;;  %1523 = vpow2.f32 %v804_v43  ;;  %v783_v47 = vsub.f32 %v1917_v5, %v761_v42 }
 0x423   : > { %v784_v44 = vsub.f32 %v1920_v6, %v763_v41 }
 0x424   : > { %v1957_v40 = vpop.eup %1515  ;;  %v808_v51 = vmul.f32 1.442695, %v783_v47 }
 0x425   : > { %828 = vadd.xlane.f32.xlu0 %v1957_v40  ;;  %v810_v48 = vmul.f32 1.442695, %v784_v44  ;;  %v765_v49 = vpop.xlane.xlu0 %764 }
 0x426   : > { %v767_v46 = vpop.xlane.xlu1 %766  ;;  %v785_v52 = vsub.f32 %v1925_v7, %v765_v49 }
 0x427   : > { %1525 = vpow2.f32 %v810_v48  ;;  %v786_v60 = vsub.f32 %v1929_v10, %v767_v46  ;;  %v782_v10 = vsub.f32 %v1913_v62, %v1947_v32 }
 0x428   : > { %1527 = vpow2.f32 %v808_v51  ;;  %v812_v56 = vmul.f32 1.442695, %v785_v52 }
 0x429   : > { %v1961_v45 = vpop.eup %1517  ;;  %v769_v59 = vpop.xlane.xlu0 %768  ;;  %v814_v4 = vmul.f32 1.442695, %v786_v60 }
 0x42a   : > { %834 = vadd.xlane.f32.xlu0 %v1961_v45  ;;  %v1965_v50 = vpop.eup %1519  ;;  %v771_v54 = vpop.xlane.xlu1 %770  ;;  %1529 = vpow2.f32 %v812_v56  ;;  %v787_v5 = vsub.f32 %v1933_v13, %v769_v59 }
 0x42b   : > { %v1970_v55 = vpop.eup %1521  ;;  %v788_v57 = vsub.f32 %v1936_v3, %v771_v54  ;;  %v806_v3 = vmul.f32 1.442695, %v782_v10 }
 0x42c   : > { %v1974_v58 = vpop.eup %1523  ;;  %v816_v8 = vmul.f32 1.442695, %v787_v5 }
 0x42d   : > { %v818_v61 = vmul.f32 1.442695, %v788_v57  ;;  %v773_v6 = vpop.xlane.xlu0 %772 }
 0x42e   : > { %830 = vadd.xlane.f32.xlu0 %v1965_v50  ;;  %v789_v9 = vsub.f32 %v1941_v14, %v773_v6 }
 0x42f   : > { %1531 = vpow2.f32 %v818_v61 }
 0x430   : > { %1533 = vpow2.f32 %v814_v4  ;;  %v820_v12 = vmul.f32 1.442695, %v789_v9 }
 0x431   : > { %v1978_v63 = vpop.eup %1525  ;;  %1535 = vpow2.f32 %v816_v8 }
 0x432   : > { %506 = vperm.xlu1 %1504, %v491_v53   ;;  %832 = vadd.xlane.f32.xlu0 %v1970_v55  ;;  %v1982_v7 = vpop.eup %1527  ;;  %1537 = vpow2.f32 %v820_v12 }
 0x433   : > { %1539 = vpow2.f32 %v806_v3 }
 0x434   : > { %v1986_v11 = vpop.eup %1529 }
 0x436   : > { %836 = vadd.xlane.f32.xlu0 %v1974_v58 }
 0x439   : > { %v1991_v13 = vpop.eup %1531 }
 0x43a   : > { %842 = vadd.xlane.f32.xlu0 %v1978_v63  ;;  %v1994_v15 = vpop.eup %1533 }
 0x43b   : > { %v1997_v14 = vpop.eup %1535 }
 0x43c   : > { %v2000_v17 = vpop.eup %1537 }
 0x43d   : > { %v2003_v62 = vpop.eup %1539 }
 0x43e   : > { %840 = vadd.xlane.f32.xlu0 %v1982_v7 }
 0x442   : > { %844 = vadd.xlane.f32.xlu0 %v1986_v11 }
 0x446   : > { %850 = vadd.xlane.f32.xlu0 %v1991_v13 }
 0x44a   : > { %846 = vadd.xlane.f32.xlu0 %v1994_v15 }
 0x44e   : > { %848 = vadd.xlane.f32.xlu0 %v1997_v14 }
 0x452   : > { %852 = vadd.xlane.f32.xlu0 %v2000_v17 }
 0x456   : > { %838 = vadd.xlane.f32.xlu1 %v2003_v62 }
 0x4aa   : > { %v827_v1 = vpop.xlane.xlu1 %826 }
 0x4ae   : > { %v825_v16 = vpop.xlane.xlu0 %824  ;;  %v823_v20 = vpop.xlane.xlu1 %822 }
 0x4af   : > { %1541 = vrcp.f32 %v825_v16 }
 0x4b0   : > { %1543 = vrcp.f32 %v823_v20 }
 0x4b1   : > { %1545 = vrcp.f32 %v827_v1  ;;  %v1507_v1 = vld [vmem:[%s1807_s18] sm:$0xff]  }
 0x4b2   : > { %v829_v21 = vpop.xlane.xlu0 %828  ;;  %v507_v0 = vpop.permute.xlu1 %506  ;;  %1401 = vmatprep.mubr.msk.bf16.mxu1 %vm598_vm2, %v1507_v1 }
 0x4b3   : > { %1547 = vrcp.f32 %v829_v21  ;;  %v567_v18 = vadd.f32 %v1888_v24, %v507_v0 }
 0x4b5   : > { %v574_v2 = vpack.c.bf16 %v567_v18, %v567_v18 }
 0x4b7   : > { %v835_v19 = vpop.xlane.xlu0 %834  ;;  %1367 = vmatprep.subr.bf16.mxu0 %v574_v2 }
 0x4b8   : > { %1368 = vmatpush3.bf16.xpose.msra.mxu0 %v574_v2 }
 0x4b9   : > { %v1542_v22 = vpop.eup %1541 }
 0x4ba   : > { %v1544_v23 = vpop.eup %1543  ;;  %v871_v25 = vmul.f32 %v1542_v22, %v1952_v36 }
 0x4bb   : > { %v1546_v26 = vpop.eup %1545  ;;  %v831_v27 = vpop.xlane.xlu0 %830  ;;  %v870_v28 = vmul.f32 %v1544_v23, %v1949_v33 }
 0x4bc   : > { %1549 = vrcp.f32 %v831_v27  ;;  %v872_v32 = vmul.f32 %v1546_v26, %v1944_v30 }
 0x4bd   : > { %v1548_v29 = vpop.eup %1547  ;;  %v886_v31 = vpack.c.bf16 %v871_v25, %v870_v28 }
 0x4be   : > { %v873_v34 = vmul.f32 %v1548_v29, %v1957_v40 }
 0x4bf   : > { %1369 = vmatprep.mubr.bf16.mxu0 %v886_v31  ;;  %v833_v24 = vpop.xlane.xlu0 %832 }
 0x4c0   : > { %1551 = vrcp.f32 %v833_v24  ;;  %v887_v35 = vpack.c.bf16 %v873_v34, %v872_v32 }
 0x4c1   : > { %1553 = vrcp.f32 %v835_v19 }
 0x4c2   : > { %1370 = vmatmul.mubr.bf16.vlgmr.msra.gmra.mrb[4].mxu0 %v887_v35 }
 0x4c3   : > { %v837_v37 = vpop.xlane.xlu0 %836 }
 0x4c4   : > { %1555 = vrcp.f32 %v837_v37 }
 0x4c6   : > { %v1550_v38 = vpop.eup %1549 }
 0x4c7   : > { %v843_v36 = vpop.xlane.xlu0 %842  ;;  %v874_v33 = vmul.f32 %v1550_v38, %v1965_v50 }
 0x4c8   : > { %1557 = vrcp.f32 %v843_v36 }
 0x4ca   : > { %v1552_v39 = vpop.eup %1551 }
 0x4cb   : > { %v841_v41 = vpop.xlane.xlu0 %840  ;;  %v875_v42 = vmul.f32 %v1552_v39, %v1970_v55  ;;  %v1554_v43 = vpop.eup %1553 }
 0x4cc   : > { %v876_v46 = vmul.f32 %v1554_v43, %v1961_v45  ;;  %1559 = vrcp.f32 %v841_v41 }
 0x4cd   : > { %v888_v30 = vpack.c.bf16 %v875_v42, %v874_v33 }
 0x4ce   : > { %v1556_v44 = vpop.eup %1555 }
 0x4cf   : > { %v845_v40 = vpop.xlane.xlu0 %844  ;;  %1373 = vmatprep.mubr.bf16.mxu0 %v888_v30  ;;  %v877_v47 = vmul.f32 %v1556_v44, %v1974_v58  ;;  %v1508_v30 = vld [vmem:[%s1807_s18 + $0x8] sm:$0xff]   ;;  %v993_v44 = vld [vmem:[#allocation3 + $0x10] sm:$0xff] }
 0x4d0   : > { %1561 = vrcp.f32 %v845_v40  ;;  %v991_v40 = vld [vmem:[#allocation3] sm:$0xff] }
 0x4d1   : > { %v889_v48 = vpack.c.bf16 %v877_v47, %v876_v46  ;;  %v994_v47 = vld [vmem:[#allocation3 + $0x18] sm:$0xff] }
 0x4d2   : > { %v1558_v54 = vpop.eup %1557 }
 0x4d3   : > { %v851_v49 = vpop.xlane.xlu0 %850  ;;  %1374 = vmatmul.mubr.bf16.gmra.mrb[8].mxu0 %v889_v48  ;;  %v880_v5 = vmul.f32 %v1558_v54, %v1978_v63 }
 0x4d6   : > { %v1560_v55 = vpop.eup %1559 }
 0x4d7   : > { %v847_v51 = vpop.xlane.xlu0 %846  ;;  %v879_v61 = vmul.f32 %v1560_v55, %v1982_v7 }
 0x4da   : > { %v1562_v56 = vpop.eup %1561 }
 0x4db   : > { %v849_v52 = vpop.xlane.xlu0 %848  ;;  %v881_v59 = vmul.f32 %v1562_v56, %v1986_v11  ;;  %v1118_v56 = vld [vmem:[%s2133_s6 + $0x10] sm:$0xff] (!%p1300_p1) }
 0x4dc   : > { %1563 = vrcp.f32 %v849_v52 }
 0x4dd   : > { %1565 = vrcp.f32 %v847_v51  ;;  %v891_v9 = vpack.c.bf16 %v881_v59, %v880_v5  ;;  %v992_v51 = vld [vmem:[#allocation3 + $0x8] sm:$0xff]  ;;  %v1117_v59 = vld [vmem:[%s2133_s6 + $0x8] sm:$0xff] (!%p1300_p1) }
 0x4df   : > { %v853_v53 = vpop.xlane.xlu0 %852 }
 0x4e3   : > { %v839_v50 = vpop.xlane.xlu1 %838 }
 0x4e4   : > { %1567 = vrcp.f32 %v839_v50 }
 0x4e5   : > { %1569 = vrcp.f32 %v853_v53 }
 0x4e6   : > { %1571 = vrcp.f32 %v851_v49  ;;  %v1564_v45 = vpop.eup %1563 }
 0x4e7   : > { %v1566_v57 = vpop.eup %1565  ;;  %v883_v4 = vmul.f32 %v1564_v45, %v1997_v14  ;;  %v1116_v45 = vld [vmem:[%s2133_s6] sm:$0xff] (!%p1300_p1) }
 0x4e8   : > { %v882_v8 = vmul.f32 %v1566_v57, %v1994_v15  ;;  %v1674_v57 = vmov (!%p1300_p1), 0  }
 0x4e9   : > { %1574 = vset.pattern.permute.xlu1 (!%p1300_p1), %v1674_v57  ;;  %1573 = vset.pattern.permute.xlu0 (!%p1300_p1), %v1674_v57 }
 0x4ea   : > { %v892_v12 = vpack.c.bf16 %v883_v4, %v882_v8  ;;  %1132 = vperm.xlu1 (!%p1300_p1), %1574, %v1118_v56   ;;  %1122 = vperm.xlu0 (!%p1300_p1), %1573, %v1116_v45   ;;  %v1104_v4 = vld [vmem:[%s1797_s10] sm:$0xff] (!%p1300_p1) }
 0x4ee   : > { %v1568_v58 = vpop.eup %1567  ;;  %1127 = vperm.xlu0 (!%p1300_p1), %1573, %v1117_v59  }
 0x4ef   : > { %v878_v60 = vmul.f32 %v1568_v58, %v2003_v62  ;;  %v1570_v10 = vpop.eup %1569  ;;  %v1119_v58 = vld [vmem:[%s2133_s6 + $0x18] sm:$0xff] (!%p1300_p1) }
 0x4f0   : > { %v1572_v3 = vpop.eup %1571  ;;  %v885_v11 = vmul.f32 %v1570_v10, %v2000_v17  ;;  %1137 = vperm.xlu1 (!%p1300_p1), %1574, %v1119_v58  }
 0x4f1   : > { %v890_v6 = vpack.c.bf16 %v879_v61, %v878_v60  ;;  %v884_v62 = vmul.f32 %v1572_v3, %v1991_v13  ;;  %v1106_v60 = vld [vmem:[%s1797_s10 + $0x10] sm:$0xff] (!%p1300_p1) }
 0x4f3   : > { %1377 = vmatprep.mubr.bf16.mxu0 %v890_v6  ;;  %v893_v7 = vpack.c.bf16 %v885_v11, %v884_v62 }
 0x4f4   : > { %1378 = vmatmul.mubr.bf16.gmra.mrb[12].mxu0 %v891_v9  ;;  %v1107_v9 = vld [vmem:[%s1797_s10 + $0x18] sm:$0xff] (!%p1300_p1) }
 0x4f5   : > { %1381 = vmatprep.mubr.bf16.mxu0 %v892_v12  ;;  %v1105_v12 = vld [vmem:[%s1797_s10 + $0x8] sm:$0xff] (!%p1300_p1) }
 0x4fc   : > { %1382 = vmatmul.mubr.bf16.gmra.mrb[16].mxu0 %v893_v7 }
 0x569   : > { %v1133_v11 = vpop.permute.xlu1 (!%p1300_p1), %1132  ;;  %v1123_v62 = vpop.permute.xlu0 (!%p1300_p1), %1122 }
 0x595   : > { %v1371_v63 = vpop.f32.mrb[4].mxu0 }
 0x596   : > { %v928_v14 = vpop.f32.mrb[5].mxu0 }
 0x597   : > { %v1372_v16 = vpop.f32.mrb[6].mxu0 }
 0x598   : > { %v996_v15 = vpack.c.bf16 %v1372_v16, %v1371_v63  ;;  %v931_v20 = vpop.f32.mrb[7].mxu0  ;;  %v1138_v16 = vpop.permute.xlu1 (!%p1300_p1), %1137 }
 0x599   : > { %v995_v21 = vpack.c.bf16 %v931_v20, %v928_v14 }
 0x59a   : > { %v1023_v13 = vsel %vm598_vm2, %v996_v15, 0 }
 0x59b   : > { %v1020_v0 = vsel %vm598_vm2, %v995_v21, 0  ;;  %1406 = vmatprep.subr.msk.bf16.mxu1 %vm598_vm2, %v995_v21 }
 0x59c   : > { %1386 = vmatpush3.bf16.xpose.msra.mxu1 %v1020_v0 }
 0x59d   : > { %1407 = vmatprep.subr.msk.bf16.mxu1 %vm598_vm2, %v996_v15  ;;  %v1128_v15 = vpop.permute.xlu0 (!%p1300_p1), %1127 }
 0x5a4   : > { %1388 = vmatpush3.bf16.xpose.msra.mxu1 %v1023_v13 }
 0x5a6   : > { %v1375_v17 = vpop.f32.mrb[8].mxu0 }
 0x5a7   : > { %v944_v18 = vpop.f32.mrb[9].mxu0 }
 0x5a8   : > { %v1376_v2 = vpop.f32.mrb[10].mxu0 }
 0x5a9   : > { %v998_v19 = vpack.c.bf16 %v1376_v2, %v1375_v17  ;;  %v947_v22 = vpop.f32.mrb[11].mxu0 }
 0x5aa   : > { %v997_v23 = vpack.c.bf16 %v947_v22, %v944_v18 }
 0x5ab   : > { %v1029_v26 = vsel %vm598_vm2, %v998_v19, 0 }
 0x5ac   : > { %v1026_v25 = vsel %vm598_vm2, %v997_v23, 0  ;;  %1408 = vmatprep.subr.msk.bf16.mxu1 %vm598_vm2, %v997_v23 }
 0x5ad   : > { %1390 = vmatpush3.bf16.xpose.msra.mxu1 %v1026_v25 }
 0x5ae   : > { %1409 = vmatprep.subr.msk.bf16.mxu1 %vm598_vm2, %v998_v19 }
 0x5b5   : > { %1392 = vmatpush3.bf16.xpose.msra.mxu1 %v1029_v26 }
 0x5c7   : > { %v1379_v27 = vpop.f32.mrb[12].mxu0 }
 0x5c8   : > { %v960_v28 = vpop.f32.mrb[13].mxu0 }
 0x5c9   : > { %v1380_v29 = vpop.f32.mrb[14].mxu0 }
 0x5ca   : > { %v1000_v31 = vpack.c.bf16 %v1380_v29, %v1379_v27  ;;  %v963_v32 = vpop.f32.mrb[15].mxu0 }
 0x5cb   : > { %v999_v34 = vpack.c.bf16 %v963_v32, %v960_v28 }
 0x5cc   : > { %v1035_v33 = vsel %vm598_vm2, %v1000_v31, 0 }
 0x5cd   : > { %v1032_v24 = vsel %vm598_vm2, %v999_v34, 0  ;;  %1410 = vmatprep.subr.msk.bf16.mxu1 %vm598_vm2, %v999_v34 }
 0x5ce   : > { %1394 = vmatpush3.bf16.xpose.msra.mxu1 %v1032_v24 }
 0x5cf   : > { %v1383_v35 = vpop.f32.mrb[16].mxu0  ;;  %1411 = vmatprep.subr.msk.bf16.mxu1 %vm598_vm2, %v1000_v31 }
 0x5d0   : > { %v976_v37 = vpop.f32.mrb[17].mxu0 }
 0x5d1   : > { %v1384_v36 = vpop.f32.mrb[18].mxu0 }
 0x5d2   : > { %v1002_v38 = vpack.c.bf16 %v1384_v36, %v1383_v35  ;;  %v979_v39 = vpop.f32.mrb[19].mxu0 }
 0x5d3   : > { %v1001_v41 = vpack.c.bf16 %v979_v39, %v976_v37 }
 0x5d4   : > { %v1041_v43 = vsel %vm598_vm2, %v1002_v38, 0 }
 0x5d5   : > { %v1038_v42 = vsel %vm598_vm2, %v1001_v41, 0 }
 0x5d6   : > { %1396 = vmatpush3.bf16.xpose.msra.mxu1 %v1035_v33 }
 0x5d7   : > { %1412 = vmatprep.subr.msk.bf16.mxu1 %vm598_vm2, %v1001_v41 }
 0x5de   : > { %1398 = vmatpush3.bf16.xpose.msra.mxu1 %v1038_v42 }
 0x5df   : > { %1413 = vmatprep.subr.msk.bf16.mxu1 %vm598_vm2, %v1002_v38 }
 0x5e6   : > { %1400 = vmatpush3.bf16.xpose.msra.mxu1 %v1041_v43 }
 0x5ed   : > { %1402 = vmatmul.mubr.msk.bf16.vlgmr.msra.gmra.mrb[16].mxu1 %vm598_vm2, %v1508_v30 }
 0x6c0   : > { %v1403_v46 = vpop.f32.mrb[16].mxu1  ;;  %1103 = sbr.rel (%p1300_p1) target bundleno = 1747 (0x6d3), region = 56 }
 0x6c1   : > { %v1094_v48 = vadd.f32 %v1403_v46, %v993_v44  ;;  %v1077_v49 = vpop.f32.mrb[17].mxu1 }
 0x6c2   : > { %v1092_v52 = vadd.f32 %v1077_v49, %v991_v40  ;;  %v1404_v50 = vpop.f32.mrb[18].mxu1 }
 0x6c3   : > { %1098 = vst [vmem:[#allocation3 + $0x10] sm:$0xff] %v1094_v48  ;;  %v1095_v53 = vadd.f32 %v1404_v50, %v994_v47  ;;  %v1080_v54 = vpop.f32.mrb[19].mxu1 }
 0x6c4   : > { %1096 = vst [vmem:[#allocation3] sm:$0xff] %v1092_v52  ;;  %v1093_v55 = vadd.f32 %v1080_v54, %v992_v51 }
 0x6c5   : > { %1099 = vst [vmem:[#allocation3 + $0x18] sm:$0xff] %v1095_v53 }
 0x6c6   : > { %1097 = vst [vmem:[#allocation3 + $0x8] sm:$0xff] %v1093_v55 }
 0x6ca   : > { %v1110_v61 = vld [vmem:[#allocation3 + $0x10] sm:$0xff] }
 0x6cb   : > { %v1108_v5 = vld [vmem:[#allocation3] sm:$0xff]  ;;  %v1114_v6 = vadd.f32 %v1110_v61, %v1106_v60 }
 0x6cc   : > { %v1112_v8 = vadd.f32 %v1108_v5, %v1104_v4  ;;  %v1111_v10 = vld [vmem:[#allocation3 + $0x18] sm:$0xff] }
 0x6cd   : > { %v1109_v3 = vld [vmem:[#allocation3 + $0x8] sm:$0xff]  ;;  %v1142_v7 = vadd.f32 %v1133_v11, %v1114_v6  ;;  %v1115_v63 = vadd.f32 %v1111_v10, %v1107_v9 }
 0x6ce   : > { %v1140_v1 = vadd.f32 %v1123_v62, %v1112_v8  ;;  %v1113_v14 = vadd.f32 %v1109_v3, %v1105_v12 }
 0x6cf   : > { %1146 = vst [vmem:[%s1814_s22 + $0x10] sm:$0xff] %v1142_v7  ;;  %v1143_v20 = vadd.f32 %v1138_v16, %v1115_v63 }
 0x6d0   : > { %1144 = vst [vmem:[%s1814_s22] sm:$0xff] %v1140_v1  ;;  %v1141_v21 = vadd.f32 %v1128_v15, %v1113_v14 }
 0x6d1   : > { %1147 = vst [vmem:[%s1814_s22 + $0x18] sm:$0xff] %v1143_v20 }
 0x6d2   : > { %1145 = vst [vmem:[%s1814_s22 + $0x8] sm:$0xff] %v1141_v21 }
 0x6d3 PF: > { %s1308_s10 = sshll.u32 %s1657_s28, 9  ;;  %s1162_s15 = sshll.u32 %s1814_s22, 4  ;;  %s2071_s15 = int_to_ptr.vmem [resolvable:$true] %s1162_s15 }
 0x6d4   : > { %s2068_s9 = scalar_lea.hbm %s2134_s7, %s1308_s10  ;;  %s2152_s16 = sand.u32 1, %s1645_s25  }
 0x6d5   : > { %s2075_s20 = scalar_lea.sflag [#allocation5], %s2152_s16  ;;  %s1575_s26 = scalar_lea.vmem %s2071_s15, 512 }
 0x6d6   : > { %p1576_p2 = scmp.ne.s32.totalorder %s2071_s15, %s1575_s26  ;;  %s1675_s28 = smov [#allocation4]  }
 0x6d7   : > { %s1579_s30 = sshll.u32 %s1675_s28, 4  ;;  %s1580_s30 = int_to_ptr.vmem [resolvable:$false] %s1579_s30 }
 0x6d8   : > { %p1577_p4 = pnand %p1576_p2, %p1767_p3  ;;  %s1581_s11 = scalar_lea.vmem %s1580_s30, 1024 }
 0x6d9   : > { %p1582_p6 = scmp.lt.s32.totalorder %s2071_s15, %s1580_s30  ;;  %p1583_p7 = scmp.lt.s32.totalorder %s1581_s11, %s1575_s26 }
 0x6da   : > { %p1578_p5 = pneg %p1577_p4 }
 0x6db   : > { %p1584_p8 = por %p1583_p7, %p1582_p6 }
 0x6dd   : > { %p1585_p10 = pnand %p1584_p8, %p1578_p5 }
 0x6df   : > { %1588 = shalt.err (!%p1585_p10)
}
 0x6e0   : > { %s1589_s22 = scalar_lea.hbm %s2068_s9, 512  ;;  %s1593_s18 = scalar_lea.hbm %s2134_s7, 1024 }
 0x6e1   : > { %p1590_p11 = scmp.ne.s32.totalorder %s2068_s9, %s1589_s22  ;;  %p1594_p0 = scmp.lt.u32.totalorder %s2068_s9, %s2134_s7 }
 0x6e2   : > { %p1595_p1 = scmp.lt.u32.totalorder %s1593_s18, %s1589_s22  ;;  %p1597_p4 = scmp.lt.u32.totalorder %s1589_s22, %s2068_s9 }
 0x6e3   : > { %p1591_p12 = pnand %p1590_p11, %p1767_p3 }
 0x6e4   : > { %p1596_p2 = por %p1595_p1, %p1594_p0 }
 0x6e5   : > { %p1592_p13 = pneg %p1591_p12 }
 0x6e6   : > { %p1598_p5 = por %p1597_p4, %p1596_p2 }
 0x6e8   : > { %p1599_p6 = pnand %p1598_p5, %p1592_p13 }
 0x6ea   : > { %1602 = shalt.err (!%p1599_p6)
}
 0x6eb   : > { %s1676_s27 = smov 128   ;;  %s1677_s17 = smov 8  }
 0x6ec   : > { %1416 = dma.vmem_to_hbm [thread:$0]  (%p1767_p3), %s2071_s15, 512, %s2068_s9, %s2075_s20, %s1676_s27, %s1676_s27, %s1677_s17  }
 0x6ed PF: > { %s2153_s19 = sld [smem:[#allocation7_spill]]  ;;  %p1422_p7 = scmp.ge.s32.totalorder %s1669_s8, 2 }
 0x6ef   : > { %p1419_p8 = pnand %p1422_p7, %p1777_p9 }
 0x6f3   : > { %s1177_s21 = sand.u32 1, %s2153_s19  }
 0x6f4   : > { %s1178_s23 = scalar_lea.sflag [#allocation5], %s1177_s21 }
 0x6f5   : > { %1636 = dma.done.wait (!%p1419_p8), %s1178_s23, 512  }
 0x6f6   : > { %1638 = vsyncadd (!%p1419_p8), %s1178_s23, 4294966784  ;;  %s20_s8 = sadd.s32 1, %s1669_s8   ;;  %s2155_s16 = sld [smem:[#allocation8_spill]] }
 0x6f7   : > { %p17_p10 = scmp.ge.s32.totalorder %s20_s8, 10   ;;  %s2156_s26 = sld [smem:[#allocation14_spill]] }
 0x6f8   : > { %s2157_s27 = sld [smem:[#allocation9_spill]]  ;;  %s2158_s28 = sld [smem:[#allocation10_spill]] }
 0x6f9   : > { %s2159_s29 = sld [smem:[#allocation11_spill]]  ;;  %s2160_s30 = sld [smem:[#allocation12_spill]] }
 0x6fa   : > { %s2161_s24 = smov %s1645_s25  ;;  %19 = sbr.rel (!%p17_p10) target bundleno = 5 (0x5), region = 100 }
 0x6fc   : > { %s2162_s25 = smov %s2155_s16 }
 0x701   :  { %1183 = vsyncpa [#allocation5], 1 }
 0x702   :  { %1185 = vsyncpa [#allocation5 + $0x1], 1 }

</bundles_post_ra>
